<compile_context>
chip_gen: v5e
topology: v5e:2x2
jax: 0.10.0
libtpu: 0.0.40
codegen_flags: <defaults>
</compile_context>

<pallas_src>
import functools
import math
from collections import OrderedDict
from typing import NamedTuple, Optional, Tuple

import numpy as np
import jax
import jax.numpy as jnp
from jax.experimental import pallas as pl
from jax.experimental.pallas import tpu as pltpu

_LANE = 128            # f32 lane width
_SUBLANE = 8           # f32 sublane count
_MAX_BATCH_TILE = 512  # review: 256-512 on v5e/v6e; consider 256 on v7x (64 MiB VMEM)


def _round_up(x, m):
    return (x + m - 1) // m * m


# ----------------------------------------------------------------------------
# Static configuration of one packed MLP stack (hashable -> jit static arg).
# ----------------------------------------------------------------------------
class _MLPConfig(NamedTuple):
    num_hidden: int                 # number of hidden->hidden layers (L - 2)
    relu_last: bool                 # ReLU after the last layer (outermost_linear=False)
    offsets: Tuple[int, ...]        # per-head lane offset into the ragged N axis
    widths: Tuple[int, ...]         # per-head padded lane width (multiple of 128)
    out_dims: Tuple[int, ...]       # per-head true out_features
    buffered_weights: bool = True   # single-buffer the grid-invariant weight blocks


# ----------------------------------------------------------------------------
# Pallas kernel: one grid step = full MLP (ALL heads) for one batch tile.
# ----------------------------------------------------------------------------
def _mlp_kernel(num_hidden, relu_last, offsets, widths, z_ref, *refs):
    """
    z_ref  : (TB, Din_pad)                  padded input rows (f32)
    w0_ref : (H, Din_pad, Dh_pad)           first-layer weights (f32 or bf16)
    b0_ref : (H, 1, Dh_pad)                 first-layer biases (f32)
    wh_ref : (H, L_hid, Dh_pad, Dh_pad)     hidden-layer weights (optional)
    bh_ref : (H, L_hid, 1, Dh_pad)          hidden-layer biases (optional)
    wl_ref : (Dh_pad, N_total)              last-layer weights, ragged-packed along N
    bl_ref : (1, N_total)                   last-layer biases
    o_ref  : (TB, N_total)                  lane-dense ragged output slab (f32)
    """
    if num_hidden > 0:
        w0_ref, b0_ref, wh_ref, bh_ref, wl_ref, bl_ref, o_ref = refs
    else:
        w0_ref, b0_ref, wl_ref, bl_ref, o_ref = refs
        wh_ref = bh_ref = None

    cdt = w0_ref.dtype                       # compute/operand dtype (f32 or bf16)
    z = z_ref[...].astype(cdt)
    num_heads = w0_ref.shape[0]

    for h in range(num_heads):               # static loop: heads collapsed in-kernel
        a = jnp.dot(z, w0_ref[h], preferred_element_type=jnp.float32) + b0_ref[h]
        a = jnp.maximum(a, 0.0)
        for l in range(num_hidden):
            a = jnp.dot(a.astype(cdt), wh_ref[h, l],
                        preferred_element_type=jnp.float32) + bh_ref[h, l]
            a = jnp.maximum(a, 0.0)
        off, w = offsets[h], widths[h]        # static, 128-aligned -> unmasked stores
        y = jnp.dot(a.astype(cdt), wl_ref[:, off:off + w],
                    preferred_element_type=jnp.float32) + bl_ref[:, off:off + w]
        if relu_last:
            y = jnp.maximum(y, 0.0)
        o_ref[:, off:off + w] = y.astype(o_ref.dtype)


# ----------------------------------------------------------------------------
# Jitted wrapper: pads z, launches ONE pallas_call, slices per-head outputs.
# ----------------------------------------------------------------------------
@functools.partial(jax.jit, static_argnames=("cfg",))
def _mlp_forward(z, w0, b0, wh, bh, wl, bl, *, cfg: _MLPConfig):
    B, d_in = z.shape
    _, din_p, dh_p = w0.shape
    n_total = wl.shape[1]

    # --- batch tile selection: as big as sensibly fits (amortizes ~0.35us/step and
    #     re-uses the resident weights across more MXU work), shrunk when the ragged
    #     output axis is very wide.
    row_bytes = (din_p + n_total) * 4 * 2          # z + out tiles, double-buffered, f32
    cap = max(_SUBLANE,
              min(_MAX_BATCH_TILE, ((16 << 20) // row_bytes) // _SUBLANE * _SUBLANE))
    if B <= cap:
        tb = _round_up(max(B, _SUBLANE), _SUBLANE)
    else:
        tb = cap
    b_pad = _round_up(max(B, _SUBLANE), tb)

    # Padding done inside jit (no extra un-fused XLA ops outside).
    z_pad = jnp.pad(z.astype(jnp.float32), ((0, b_pad - B), (0, din_p - d_in)))

    have_hidden = cfg.num_hidden > 0
    operands = [z_pad, w0, b0] + ([wh, bh] if have_hidden else []) + [wl, bl]

    def _const_spec(arr):
        nd = arr.ndim
        idx = lambda i, nd=nd: (0,) * nd           # grid-invariant block
        if cfg.buffered_weights:
            # Single-buffer the weight blocks: their index never changes, so double
            # buffering is pure VMEM cost (key on v7x's 64 MiB VMEM).
            return pl.BlockSpec(arr.shape, idx, pipeline_mode=pl.Buffered(1))
        return pl.BlockSpec(arr.shape, idx)

    in_specs = [pl.BlockSpec((tb, din_p), lambda i: (i, 0))] + \
               [_const_spec(a) for a in operands[1:]]
    out_specs = pl.BlockSpec((tb, n_total), lambda i: (i, 0))

    # --- explicit VMEM budget from actual buffer sizes (defaults of 16/32 MiB are too
    #     small for real configs; cap well below the physical 64-128 MiB).
    wbytes = sum(int(np.prod(a.shape)) * a.dtype.itemsize for a in operands[1:])
    wbytes *= 1 if cfg.buffered_weights else 2
    io_bytes = 2 * tb * (din_p + n_total) * 4
    act_bytes = 4 * tb * (dh_p + max(cfg.widths)) * 4
    vmem_limit = int(min(100 << 20,
                         max(32 << 20, (wbytes + io_bytes + act_bytes) * 1.4 + (4 << 20))))

    kernel = functools.partial(_mlp_kernel, cfg.num_hidden, cfg.relu_last,
                               cfg.offsets, cfg.widths)
    out_pad = pl.pallas_call(
        kernel,
        out_shape=jax.ShapeDtypeStruct((b_pad, n_total), jnp.float32),
        grid=(b_pad // tb,),
        in_specs=in_specs,
        out_specs=out_specs,
        compiler_params=pltpu.CompilerParams(
            dimension_semantics=("parallel",),
            vmem_limit_bytes=vmem_limit),
    )(*operands)

    # Per-head slices done inside jit (true out_features, padding discarded).
    return tuple(out_pad[:B, off:off + od]
                 for off, od in zip(cfg.offsets, cfg.out_dims))


_BUFFERED_WEIGHTS_OK = True  # flips to False if this Pallas build rejects pipeline_mode


def _run_mlp(z, packed, cfg):
    global _BUFFERED_WEIGHTS_OK
    if _BUFFERED_WEIGHTS_OK:
        try:
            return _mlp_forward(z, *packed, cfg=cfg._replace(buffered_weights=True))
        except Exception:  # pl.Buffered(1) not supported -> default double buffering
            _BUFFERED_WEIGHTS_OK = False
    return _mlp_forward(z, *packed, cfg=cfg._replace(buffered_weights=False))


# ----------------------------------------------------------------------------
# Parameter construction & packing (glue, plain JAX / numpy; done once at init).
# ----------------------------------------------------------------------------
def init_fcblock_params(key, hidden_ch, num_hidden_layers, in_features,
                        out_features, last_weight_scale=1.0):
    """Mirrors FCBlock.__init__ with init_weights_normal (kaiming fan_in, relu)."""
    dims = [in_features] + [hidden_ch] * (num_hidden_layers + 1) + [out_features]
    weights, biases = [], []
    L = len(dims) - 1
    for i in range(L):
        key, kw, kb = jax.random.split(key, 3)
        fan_in, fan_out = dims[i], dims[i + 1]
        w = jax.random.normal(kw, (fan_in, fan_out), jnp.float32) * jnp.sqrt(2.0 / fan_in)
        bound = 1.0 / jnp.sqrt(fan_in)
        b = jax.random.uniform(kb, (fan_out,), jnp.float32, -bound, bound)
        if i == L - 1:
            w = w * last_weight_scale
        weights.append(w)
        biases.append(b)
    return weights, biases, key


def _pack_heads(head_weights, head_biases, *, relu_last, use_bf16_weights=False):
    """Pack H FCBlock heads (same in/hidden dims & layer count, possibly different
    out_features) into per-position-padded stacked tensors with a ragged lane-dense
    last layer.  Padded rows/cols are ZERO so they never leak into real outputs."""
    H = len(head_weights)
    L = len(head_weights[0])
    num_hidden = L - 2
    d_in, d_h = head_weights[0][0].shape
    for ws in head_weights:
        assert len(ws) == L and ws[0].shape == (d_in, d_h) and ws[-1].shape[0] == d_h

    din_p = _round_up(d_in, _LANE)
    dh_p = _round_up(d_h, _LANE)
    out_dims = tuple(int(ws[-1].shape[1]) for ws in head_weights)
    widths = tuple(_round_up(o, _LANE) for o in out_dims)
    offsets = tuple(int(x) for x in np.cumsum((0,) + widths[:-1]))
    n_total = int(sum(widths))

    w0 = np.zeros((H, din_p, dh_p), np.float32)
    b0 = np.zeros((H, 1, dh_p), np.float32)
    wh = np.zeros((H, num_hidden, dh_p, dh_p), np.float32) if num_hidden > 0 else None
    bh = np.zeros((H, num_hidden, 1, dh_p), np.float32) if num_hidden > 0 else None
    wl = np.zeros((dh_p, n_total), np.float32)
    bl = np.zeros((1, n_total), np.float32)
    for h, (ws, bs) in enumerate(zip(head_weights, head_biases)):
        w0[h, :d_in, :d_h] = np.asarray(ws[0])
        b0[h, 0, :d_h] = np.asarray(bs[0])
        for l in range(num_hidden):
            wh[h, l, :d_h, :d_h] = np.asarray(ws[1 + l])
            bh[h, l, 0, :d_h] = np.asarray(bs[1 + l])
        off, od = offsets[h], out_dims[h]
        wl[:d_h, off:off + od] = np.asarray(ws[-1])
        bl[0, off:off + od] = np.asarray(bs[-1])

    wt = jnp.bfloat16 if use_bf16_weights else jnp.float32  # biases stay f32 (accumulator)
    packed = (jnp.asarray(w0, wt), jnp.asarray(b0, jnp.float32),
              jnp.asarray(wh, wt) if wh is not None else None,
              jnp.asarray(bh, jnp.float32) if bh is not None else None,
              jnp.asarray(wl, wt), jnp.asarray(bl, jnp.float32))
    cfg = _MLPConfig(num_hidden=num_hidden, relu_last=relu_last,
                     offsets=offsets, widths=widths, out_dims=out_dims)
    return packed, cfg


# ----------------------------------------------------------------------------
# FCBlock (the spec module) — single fused Pallas kernel.
# ----------------------------------------------------------------------------
class FCBlockPallas:
    def __init__(self, hidden_ch, num_hidden_layers, in_features, out_features,
                 outermost_linear=False, *, key, use_bf16_weights=False):
        self.in_features = in_features
        self.out_features = out_features
        self.relu_last = not outermost_linear
        self.weights, self.biases, _ = init_fcblock_params(
            key, hidden_ch, num_hidden_layers, in_features, out_features)
        self.packed, self.cfg = _pack_heads(
            [self.weights], [self.biases],
            relu_last=self.relu_last, use_bf16_weights=use_bf16_weights)

    def forward(self, x):
        return _run_mlp(x, self.packed, self.cfg)[0]

    def forward_ref(self, x):            # pure-JAX f32 reference
        h = x
        L = len(self.weights)
        for i, (w, b) in enumerate(zip(self.weights, self.biases)):
            h = h @ w + b[None, :]
            if i < L - 1 or self.relu_last:
                h = jnp.maximum(h, 0.0)
        return h


# ----------------------------------------------------------------------------
# HyperNetwork of FCBlock heads — ALL heads fused into ONE pallas_call, heads
# collapsed inside the kernel, ragged lane-dense last layer / output packing.
# ----------------------------------------------------------------------------
class HyperNetworkPallas:
    def __init__(self, in_features, hidden_layers, hidden_features,
                 hypo_param_shapes, key, *, use_bf16_weights=False):
        self.names = list(hypo_param_shapes.keys())
        self.param_shapes = [tuple(int(d) for d in s)
                             for s in hypo_param_shapes.values()]
        out_dims = [max(1, math.prod(s)) for s in self.param_shapes]
        self.head_weights, self.head_biases = [], []
        for out_features in out_dims:
            w, b, key = init_fcblock_params(
                key, hidden_features, hidden_layers, in_features, out_features,
                last_weight_scale=0.1)          # hn.net[-1].weight *= 0.1
            self.head_weights.append(w)
            self.head_biases.append(b)
        self.packed, self.cfg = _pack_heads(
            self.head_weights, self.head_biases,
            relu_last=False, use_bf16_weights=use_bf16_weights)

    def forward(self, z):
        outs = _run_mlp(z, self.packed, self.cfg)
        B = z.shape[0]
        params = OrderedDict()
        for name, pshape, out in zip(self.names, self.param_shapes, outs):
            params[name] = out.reshape((B,) + pshape)
        return params

    def forward_ref(self, z):             # pure-JAX f32 reference
        params = OrderedDict()
        for name, ws, bs, pshape in zip(self.names, self.head_weights,
                                        self.head_biases, self.param_shapes):
            h = z
            L = len(ws)
            for i, (w, b) in enumerate(zip(ws, bs)):
                h = h @ w + b[None, :]
                if i < L - 1:
                    h = jnp.maximum(h, 0.0)
            params[name] = h.reshape((-1,) + pshape)
        return params


if __name__ == "__main__":
    key = jax.random.PRNGKey(0)
    key, k1, k2, k3, kz, kb = jax.random.split(key, 6)

    batch = 2
    in_features = 8
    hidden_ch = 32
    num_hidden_layers = 1
    out_features = 16

    x = jax.random.normal(kz, (batch, in_features), jnp.float32)

    # 1) FCBlock, default (outermost_linear=False -> ReLU on the last layer too), f32.
    blk = FCBlockPallas(hidden_ch, num_hidden_layers, in_features, out_features,
                        outermost_linear=False, key=k1)
    y = jax.block_until_ready(blk.forward(x))
    assert y.shape == (batch, out_features), y.shape
    assert jnp.allclose(y, blk.forward_ref(x), atol=1e-4, rtol=1e-4)

    # 2) FCBlock with a linear outermost layer, f32.
    blk_lin = FCBlockPallas(hidden_ch, num_hidden_layers, in_features,
                            out_features, outermost_linear=True, key=k2)
    y2 = jax.block_until_ready(blk_lin.forward(x))
    assert y2.shape == (batch, out_features), y2.shape
    assert jnp.allclose(y2, blk_lin.forward_ref(x), atol=1e-4, rtol=1e-4)

    # 3) Same block with bf16 weights + f32 accumulation (looser tolerance vs f32 ref).
    blk_bf16 = FCBlockPallas(hidden_ch, num_hidden_layers, in_features,
                             out_features, outermost_linear=True, key=k2,
                             use_bf16_weights=True)
    y3 = jax.block_until_ready(blk_bf16.forward(x))
    assert y3.shape == (batch, out_features), y3.shape
    assert jnp.allclose(y3, blk_bf16.forward_ref(x), atol=5e-2, rtol=5e-2)

    # 4) Larger batch -> multiple batch tiles: exercises the grid / pipelining path.
    big_b = 640
    xb = jax.random.normal(kb, (big_b, in_features), jnp.float32)
    yb = jax.block_until_ready(blk.forward(xb))
    assert yb.shape == (big_b, out_features), yb.shape
    assert jnp.allclose(yb, blk.forward_ref(xb), atol=1e-4, rtol=1e-4)

    # 5) Hypernetwork: one FCBlock head per hypo-net parameter; all heads collapsed
    #    into a single pallas_call with a ragged lane-dense output slab.
    hypo_param_shapes = OrderedDict([
        ("net.0.0.weight", (16, 2)),
        ("net.0.0.bias", (16,)),
        ("net.1.weight", (1, 16)),
        ("net.1.bias", (1,)),
    ])
    hyper = HyperNetworkPallas(in_features, num_hidden_layers, hidden_ch,
                               hypo_param_shapes, k3)
    params = hyper.forward(x)
    params = jax.tree_util.tree_map(jax.block_until_ready, params)
    params_ref = hyper.forward_ref(x)
    for name in params:
        assert params[name].shape == (batch,) + tuple(hypo_param_shapes[name]), (
            name, params[name].shape)
        assert jnp.allclose(params[name], params_ref[name],
                            atol=1e-4, rtol=1e-4), name

    print("KERNEL_OK")
</pallas_src>

<mosaic_0001>
module attributes {stable_mosaic.version = 11 : i64} {
  func.func @_mlp_kernel(%arg0: i32, %arg1: memref<8x128xf32, #tpu.memory_space<vmem>>, %arg2: memref<1x128x128xf32, #tpu.memory_space<vmem>>, %arg3: memref<1x1x128xf32, #tpu.memory_space<vmem>>, %arg4: memref<1x1x128x128xf32, #tpu.memory_space<vmem>>, %arg5: memref<1x1x1x128xf32, #tpu.memory_space<vmem>>, %arg6: memref<128x128xf32, #tpu.memory_space<vmem>>, %arg7: memref<1x128xf32, #tpu.memory_space<vmem>>, %arg8: memref<8x128xf32, #tpu.memory_space<vmem>>) attributes {dimension_semantics = [#tpu.dimension_semantics<parallel>], iteration_bounds = array<i64: 1>, scalar_prefetch = 0 : i64, scratch_operands = 0 : i64, tpu.core_type = #tpu.core_type<tc>, window_params = [{transform_indices = @transform_0, window_bounds = array<i64: 8, 128>}, {pipeline_mode = #tpu.pipeline_mode<synchronous>, transform_indices = @transform_1, window_bounds = array<i64: 1, 128, 128>}, {pipeline_mode = #tpu.pipeline_mode<synchronous>, transform_indices = @transform_2, window_bounds = array<i64: 1, 1, 128>}, {pipeline_mode = #tpu.pipeline_mode<synchronous>, transform_indices = @transform_3, window_bounds = array<i64: 1, 1, 128, 128>}, {pipeline_mode = #tpu.pipeline_mode<synchronous>, transform_indices = @transform_4, window_bounds = array<i64: 1, 1, 1, 128>}, {pipeline_mode = #tpu.pipeline_mode<synchronous>, transform_indices = @transform_5, window_bounds = array<i64: 128, 128>}, {pipeline_mode = #tpu.pipeline_mode<synchronous>, transform_indices = @transform_6, window_bounds = array<i64: 1, 128>}, {transform_indices = @transform_7, window_bounds = array<i64: 8, 128>}]} {
    %c0 = arith.constant 0 : index
    %c0_0 = arith.constant 0 : index
    %0 = vector.load %arg1[%c0, %c0_0] : memref<8x128xf32, #tpu.memory_space<vmem>>, vector<8x128xf32>
    %c0_1 = arith.constant 0 : index
    %c0_2 = arith.constant 0 : index
    %c0_3 = arith.constant 0 : index
    %1 = vector.load %arg2[%c0_1, %c0_2, %c0_3] : memref<1x128x128xf32, #tpu.memory_space<vmem>>, vector<1x128x128xf32>
    %2 = vector.shape_cast %1 : vector<1x128x128xf32> to vector<128x128xf32>
    %cst = arith.constant dense<0.000000e+00> : vector<8x128xf32>
    %3 = tpu.matmul %0, %2, %cst {dimension_numbers = #tpu.dot_dimension_numbers<[1], [0], [0], [1], [0, 0, 1, 1], [], []>} : vector<8x128xf32>, vector<128x128xf32>, vector<8x128xf32> -> vector<8x128xf32>
    %c0_4 = arith.constant 0 : index
    %c0_5 = arith.constant 0 : index
    %c0_6 = arith.constant 0 : index
    %4 = vector.load %arg3[%c0_4, %c0_5, %c0_6] : memref<1x1x128xf32, #tpu.memory_space<vmem>>, vector<1x1x128xf32>
    %5 = vector.shape_cast %4 : vector<1x1x128xf32> to vector<1x128xf32>
    %6 = vector.broadcast %5 : vector<1x128xf32> to vector<8x128xf32>
    %7 = arith.addf %3, %6 : vector<8x128xf32>
    %cst_7 = arith.constant 0.000000e+00 : f32
    %8 = vector.broadcast %cst_7 : f32 to vector<8x128xf32>
    %9 = arith.maximumf %7, %8 : vector<8x128xf32>
    %c0_8 = arith.constant 0 : index
    %c0_9 = arith.constant 0 : index
    %c0_10 = arith.constant 0 : index
    %c0_11 = arith.constant 0 : index
    %10 = vector.load %arg4[%c0_8, %c0_9, %c0_10, %c0_11] : memref<1x1x128x128xf32, #tpu.memory_space<vmem>>, vector<1x1x128x128xf32>
    %11 = vector.shape_cast %10 : vector<1x1x128x128xf32> to vector<128x128xf32>
    %cst_12 = arith.constant dense<0.000000e+00> : vector<8x128xf32>
    %12 = tpu.matmul %9, %11, %cst_12 {dimension_numbers = #tpu.dot_dimension_numbers<[1], [0], [0], [1], [0, 0, 1, 1], [], []>} : vector<8x128xf32>, vector<128x128xf32>, vector<8x128xf32> -> vector<8x128xf32>
    %c0_13 = arith.constant 0 : index
    %c0_14 = arith.constant 0 : index
    %c0_15 = arith.constant 0 : index
    %c0_16 = arith.constant 0 : index
    %13 = vector.load %arg5[%c0_13, %c0_14, %c0_15, %c0_16] : memref<1x1x1x128xf32, #tpu.memory_space<vmem>>, vector<1x1x1x128xf32>
    %14 = vector.shape_cast %13 : vector<1x1x1x128xf32> to vector<1x128xf32>
    %15 = vector.broadcast %14 : vector<1x128xf32> to vector<8x128xf32>
    %16 = arith.addf %12, %15 : vector<8x128xf32>
    %cst_17 = arith.constant 0.000000e+00 : f32
    %17 = vector.broadcast %cst_17 : f32 to vector<8x128xf32>
    %18 = arith.maximumf %16, %17 : vector<8x128xf32>
    %c0_18 = arith.constant 0 : index
    %c0_19 = arith.constant 0 : index
    %19 = vector.load %arg6[%c0_18, %c0_19] : memref<128x128xf32, #tpu.memory_space<vmem>>, vector<128x128xf32>
    %cst_20 = arith.constant dense<0.000000e+00> : vector<8x128xf32>
    %20 = tpu.matmul %18, %19, %cst_20 {dimension_numbers = #tpu.dot_dimension_numbers<[1], [0], [0], [1], [0, 0, 1, 1], [], []>} : vector<8x128xf32>, vector<128x128xf32>, vector<8x128xf32> -> vector<8x128xf32>
    %c0_21 = arith.constant 0 : index
    %c0_22 = arith.constant 0 : index
    %21 = vector.load %arg7[%c0_21, %c0_22] : memref<1x128xf32, #tpu.memory_space<vmem>>, vector<1x128xf32>
    %22 = vector.broadcast %21 : vector<1x128xf32> to vector<8x128xf32>
    %23 = arith.addf %20, %22 : vector<8x128xf32>
    %cst_23 = arith.constant 0.000000e+00 : f32
    %24 = vector.broadcast %cst_23 : f32 to vector<8x128xf32>
    %25 = arith.maximumf %23, %24 : vector<8x128xf32>
    %c0_24 = arith.constant 0 : index
    %c0_25 = arith.constant 0 : index
    %26 = vector.load %arg8[%c0_24, %c0_25] : memref<8x128xf32, #tpu.memory_space<vmem>>, vector<8x128xf32>
    tpu.vector_store %arg8[%c0_24, %c0_25], %25 {strides = array<i32>} : memref<8x128xf32, #tpu.memory_space<vmem>>, vector<8x128xf32>,
    return
  }
  func.func @transform_0(%arg0: i32) -> (i32, i32) {
    %c0_i32 = arith.constant 0 : i32
    %c0_i32_0 = arith.constant 0 : i32
    return %arg0, %c0_i32 : i32, i32
  }
  func.func @transform_1(%arg0: i32) -> (i32, i32, i32) {
    %c0_i32 = arith.constant 0 : i32
    %c0_i32_0 = arith.constant 0 : i32
    %c0_i32_1 = arith.constant 0 : i32
    %c0_i32_2 = arith.constant 0 : i32
    return %c0_i32, %c0_i32_0, %c0_i32_1 : i32, i32, i32
  }
  func.func @transform_2(%arg0: i32) -> (i32, i32, i32) {
    %c0_i32 = arith.constant 0 : i32
    %c0_i32_0 = arith.constant 0 : i32
    %c0_i32_1 = arith.constant 0 : i32
    %c0_i32_2 = arith.constant 0 : i32
    return %c0_i32, %c0_i32_0, %c0_i32_1 : i32, i32, i32
  }
  func.func @transform_3(%arg0: i32) -> (i32, i32, i32, i32) {
    %c0_i32 = arith.constant 0 : i32
    %c0_i32_0 = arith.constant 0 : i32
    %c0_i32_1 = arith.constant 0 : i32
    %c0_i32_2 = arith.constant 0 : i32
    %c0_i32_3 = arith.constant 0 : i32
    return %c0_i32, %c0_i32_0, %c0_i32_1, %c0_i32_2 : i32, i32, i32, i32
  }
  func.func @transform_4(%arg0: i32) -> (i32, i32, i32, i32) {
    %c0_i32 = arith.constant 0 : i32
    %c0_i32_0 = arith.constant 0 : i32
    %c0_i32_1 = arith.constant 0 : i32
    %c0_i32_2 = arith.constant 0 : i32
    %c0_i32_3 = arith.constant 0 : i32
    return %c0_i32, %c0_i32_0, %c0_i32_1, %c0_i32_2 : i32, i32, i32, i32
  }
  func.func @transform_5(%arg0: i32) -> (i32, i32) {
    %c0_i32 = arith.constant 0 : i32
    %c0_i32_0 = arith.constant 0 : i32
    %c0_i32_1 = arith.constant 0 : i32
    return %c0_i32, %c0_i32_0 : i32, i32
  }
  func.func @transform_6(%arg0: i32) -> (i32, i32) {
    %c0_i32 = arith.constant 0 : i32
    %c0_i32_0 = arith.constant 0 : i32
    %c0_i32_1 = arith.constant 0 : i32
    return %c0_i32, %c0_i32_0 : i32, i32
  }
  func.func @transform_7(%arg0: i32) -> (i32, i32) {
    %c0_i32 = arith.constant 0 : i32
    %c0_i32_0 = arith.constant 0 : i32
    return %arg0, %c0_i32 : i32, i32
  }
}

module attributes {stable_mosaic.version = 11 : i64} {
  func.func @_mlp_kernel(%arg0: i32, %arg1: memref<8x128xf32, #tpu.memory_space<vmem>>, %arg2: memref<1x128x128xf32, #tpu.memory_space<vmem>>, %arg3: memref<1x1x128xf32, #tpu.memory_space<vmem>>, %arg4: memref<1x1x128x128xf32, #tpu.memory_space<vmem>>, %arg5: memref<1x1x1x128xf32, #tpu.memory_space<vmem>>, %arg6: memref<128x128xf32, #tpu.memory_space<vmem>>, %arg7: memref<1x128xf32, #tpu.memory_space<vmem>>, %arg8: memref<8x128xf32, #tpu.memory_space<vmem>>) attributes {dimension_semantics = [#tpu.dimension_semantics<parallel>], iteration_bounds = array<i64: 1>, scalar_prefetch = 0 : i64, scratch_operands = 0 : i64, tpu.core_type = #tpu.core_type<tc>, window_params = [{transform_indices = @transform_0, window_bounds = array<i64: 8, 128>}, {pipeline_mode = #tpu.pipeline_mode<synchronous>, transform_indices = @transform_1, window_bounds = array<i64: 1, 128, 128>}, {pipeline_mode = #tpu.pipeline_mode<synchronous>, transform_indices = @transform_2, window_bounds = array<i64: 1, 1, 128>}, {pipeline_mode = #tpu.pipeline_mode<synchronous>, transform_indices = @transform_3, window_bounds = array<i64: 1, 1, 128, 128>}, {pipeline_mode = #tpu.pipeline_mode<synchronous>, transform_indices = @transform_4, window_bounds = array<i64: 1, 1, 1, 128>}, {pipeline_mode = #tpu.pipeline_mode<synchronous>, transform_indices = @transform_5, window_bounds = array<i64: 128, 128>}, {pipeline_mode = #tpu.pipeline_mode<synchronous>, transform_indices = @transform_6, window_bounds = array<i64: 1, 128>}, {transform_indices = @transform_7, window_bounds = array<i64: 8, 128>}]} {
    %c0 = arith.constant 0 : index
    %c0_0 = arith.constant 0 : index
    %0 = vector.load %arg1[%c0, %c0_0] : memref<8x128xf32, #tpu.memory_space<vmem>>, vector<8x128xf32>
    %c0_1 = arith.constant 0 : index
    %c0_2 = arith.constant 0 : index
    %c0_3 = arith.constant 0 : index
    %1 = vector.load %arg2[%c0_1, %c0_2, %c0_3] : memref<1x128x128xf32, #tpu.memory_space<vmem>>, vector<1x128x128xf32>
    %2 = vector.shape_cast %1 : vector<1x128x128xf32> to vector<128x128xf32>
    %cst = arith.constant dense<0.000000e+00> : vector<8x128xf32>
    %3 = tpu.matmul %0, %2, %cst {dimension_numbers = #tpu.dot_dimension_numbers<[1], [0], [0], [1], [0, 0, 1, 1], [], []>} : vector<8x128xf32>, vector<128x128xf32>, vector<8x128xf32> -> vector<8x128xf32>
    %c0_4 = arith.constant 0 : index
    %c0_5 = arith.constant 0 : index
    %c0_6 = arith.constant 0 : index
    %4 = vector.load %arg3[%c0_4, %c0_5, %c0_6] : memref<1x1x128xf32, #tpu.memory_space<vmem>>, vector<1x1x128xf32>
    %5 = vector.shape_cast %4 : vector<1x1x128xf32> to vector<1x128xf32>
    %6 = vector.broadcast %5 : vector<1x128xf32> to vector<8x128xf32>
    %7 = arith.addf %3, %6 : vector<8x128xf32>
    %cst_7 = arith.constant 0.000000e+00 : f32
    %8 = vector.broadcast %cst_7 : f32 to vector<8x128xf32>
    %9 = arith.maximumf %7, %8 : vector<8x128xf32>
    %c0_8 = arith.constant 0 : index
    %c0_9 = arith.constant 0 : index
    %c0_10 = arith.constant 0 : index
    %c0_11 = arith.constant 0 : index
    %10 = vector.load %arg4[%c0_8, %c0_9, %c0_10, %c0_11] : memref<1x1x128x128xf32, #tpu.memory_space<vmem>>, vector<1x1x128x128xf32>
    %11 = vector.shape_cast %10 : vector<1x1x128x128xf32> to vector<128x128xf32>
    %cst_12 = arith.constant dense<0.000000e+00> : vector<8x128xf32>
    %12 = tpu.matmul %9, %11, %cst_12 {dimension_numbers = #tpu.dot_dimension_numbers<[1], [0], [0], [1], [0, 0, 1, 1], [], []>} : vector<8x128xf32>, vector<128x128xf32>, vector<8x128xf32> -> vector<8x128xf32>
    %c0_13 = arith.constant 0 : index
    %c0_14 = arith.constant 0 : index
    %c0_15 = arith.constant 0 : index
    %c0_16 = arith.constant 0 : index
    %13 = vector.load %arg5[%c0_13, %c0_14, %c0_15, %c0_16] : memref<1x1x1x128xf32, #tpu.memory_space<vmem>>, vector<1x1x1x128xf32>
    %14 = vector.shape_cast %13 : vector<1x1x1x128xf32> to vector<1x128xf32>
    %15 = vector.broadcast %14 : vector<1x128xf32> to vector<8x128xf32>
    %16 = arith.addf %12, %15 : vector<8x128xf32>
    %cst_17 = arith.constant 0.000000e+00 : f32
    %17 = vector.broadcast %cst_17 : f32 to vector<8x128xf32>
    %18 = arith.maximumf %16, %17 : vector<8x128xf32>
    %c0_18 = arith.constant 0 : index
    %c0_19 = arith.constant 0 : index
    %19 = vector.load %arg6[%c0_18, %c0_19] : memref<128x128xf32, #tpu.memory_space<vmem>>, vector<128x128xf32>
    %cst_20 = arith.constant dense<0.000000e+00> : vector<8x128xf32>
    %20 = tpu.matmul %18, %19, %cst_20 {dimension_numbers = #tpu.dot_dimension_numbers<[1], [0], [0], [1], [0, 0, 1, 1], [], []>} : vector<8x128xf32>, vector<128x128xf32>, vector<8x128xf32> -> vector<8x128xf32>
    %c0_21 = arith.constant 0 : index
    %c0_22 = arith.constant 0 : index
    %21 = vector.load %arg7[%c0_21, %c0_22] : memref<1x128xf32, #tpu.memory_space<vmem>>, vector<1x128xf32>
    %22 = vector.broadcast %21 : vector<1x128xf32> to vector<8x128xf32>
    %23 = arith.addf %20, %22 : vector<8x128xf32>
    %cst_23 = arith.constant 0.000000e+00 : f32
    %24 = vector.broadcast %cst_23 : f32 to vector<8x128xf32>
    %25 = arith.maximumf %23, %24 : vector<8x128xf32>
    %c0_24 = arith.constant 0 : index
    %c0_25 = arith.constant 0 : index
    %26 = vector.load %arg8[%c0_24, %c0_25] : memref<8x128xf32, #tpu.memory_space<vmem>>, vector<8x128xf32>
    tpu.vector_store %arg8[%c0_24, %c0_25], %25 {strides = array<i32>} : memref<8x128xf32, #tpu.memory_space<vmem>>, vector<8x128xf32>,
    return
  }
  func.func @transform_0(%arg0: i32) -> (i32, i32) {
    %c0_i32 = arith.constant 0 : i32
    %c0_i32_0 = arith.constant 0 : i32
    return %arg0, %c0_i32 : i32, i32
  }
  func.func @transform_1(%arg0: i32) -> (i32, i32, i32) {
    %c0_i32 = arith.constant 0 : i32
    %c0_i32_0 = arith.constant 0 : i32
    %c0_i32_1 = arith.constant 0 : i32
    %c0_i32_2 = arith.constant 0 : i32
    return %c0_i32, %c0_i32_0, %c0_i32_1 : i32, i32, i32
  }
  func.func @transform_2(%arg0: i32) -> (i32, i32, i32) {
    %c0_i32 = arith.constant 0 : i32
    %c0_i32_0 = arith.constant 0 : i32
    %c0_i32_1 = arith.constant 0 : i32
    %c0_i32_2 = arith.constant 0 : i32
    return %c0_i32, %c0_i32_0, %c0_i32_1 : i32, i32, i32
  }
  func.func @transform_3(%arg0: i32) -> (i32, i32, i32, i32) {
    %c0_i32 = arith.constant 0 : i32
    %c0_i32_0 = arith.constant 0 : i32
    %c0_i32_1 = arith.constant 0 : i32
    %c0_i32_2 = arith.constant 0 : i32
    %c0_i32_3 = arith.constant 0 : i32
    return %c0_i32, %c0_i32_0, %c0_i32_1, %c0_i32_2 : i32, i32, i32, i32
  }
  func.func @transform_4(%arg0: i32) -> (i32, i32, i32, i32) {
    %c0_i32 = arith.constant 0 : i32
    %c0_i32_0 = arith.constant 0 : i32
    %c0_i32_1 = arith.constant 0 : i32
    %c0_i32_2 = arith.constant 0 : i32
    %c0_i32_3 = arith.constant 0 : i32
    return %c0_i32, %c0_i32_0, %c0_i32_1, %c0_i32_2 : i32, i32, i32, i32
  }
  func.func @transform_5(%arg0: i32) -> (i32, i32) {
    %c0_i32 = arith.constant 0 : i32
    %c0_i32_0 = arith.constant 0 : i32
    %c0_i32_1 = arith.constant 0 : i32
    return %c0_i32, %c0_i32_0 : i32, i32
  }
  func.func @transform_6(%arg0: i32) -> (i32, i32) {
    %c0_i32 = arith.constant 0 : i32
    %c0_i32_0 = arith.constant 0 : i32
    %c0_i32_1 = arith.constant 0 : i32
    return %c0_i32, %c0_i32_0 : i32, i32
  }
  func.func @transform_7(%arg0: i32) -> (i32, i32) {
    %c0_i32 = arith.constant 0 : i32
    %c0_i32_0 = arith.constant 0 : i32
    return %arg0, %c0_i32 : i32, i32
  }
}

</mosaic_0001>

<bundles_post_ra>
// kernel: _mlp_forward.1
= control target key start
LH: loop header
LB: loop body
LE: loop exit
PB: predicated region body
PF: predicated region fallthrough
CT: control target
= control target key end

     0   :  { %12 = vsyncpa [#allocation3], 0  ;;  %s357_s0 = inlined_call_operand.vmem [shape: f32[8,128], index: 0, kind: input, shape index: {}]   ;;  %s358_s1 = inlined_call_operand.hbm [shape: f32[1,128,128], index: 1, kind: input, shape index: {}]   ;;  %s359_s2 = inlined_call_operand.vmem [shape: f32[1,1,128], index: 2, kind: input, shape index: {}]   ;;  %s360_s3 = inlined_call_operand.hbm [shape: f32[1,1,128,128], index: 3, kind: input, shape index: {}]   ;;  %s361_s4 = inlined_call_operand.vmem [shape: f32[1,1,1,128], index: 4, kind: input, shape index: {}]   ;;  %s362_s5 = inlined_call_operand.hbm [shape: f32[128,128], index: 5, kind: input, shape index: {}]   ;;  %s363_s6 = inlined_call_operand.vmem [shape: f32[1,128], index: 6, kind: input, shape index: {}]   ;;  %s364_s7 = inlined_call_operand.vmem [shape: f32[8,128], index: 7, kind: output, shape index: {}]  }
   0x1   :  { %13 = vsyncpa [#allocation5], 0  ;;  %s35_s26 = sshll.u32 %s360_s3, 4  ;;  %s288_s27 = smov [#allocation4]   ;;  %s36_s26 = int_to_ptr.hbm [resolvable:$true] %s35_s26 }
   0x2   :  { %s37_s28 = sshll.u32 %s288_s27, 4  ;;  %s20_s8 = sshll.u32 %s358_s1, 4  ;;  %s38_s28 = int_to_ptr.vmem [resolvable:$true] %s37_s28  ;;  %s21_s8 = int_to_ptr.hbm [resolvable:$true] %s20_s8 }
   0x3   :  { %s289_s9 = smov 128   ;;  %s290_s10 = smov 8  }
   0x4   :  { %43 = dma.hbm_to_vmem [thread:$0]  %s36_s26, 2048, %s38_s28, [#allocation5], %s289_s9, %s289_s9, %s290_s10  }
   0x5   :  { %s291_s11 = smov [#allocation2]   ;;  %s50_s15 = sshll.u32 %s362_s5, 4  ;;  %s51_s15 = int_to_ptr.hbm [resolvable:$true] %s50_s15 }
   0x6   :  { %s22_s12 = sshll.u32 %s291_s11, 4  ;;  %s292_s3 = smov [#allocation6]   ;;  %s23_s12 = int_to_ptr.vmem [resolvable:$true] %s22_s12 }
   0x7   :  { %28 = dma.hbm_to_vmem [thread:$0]  %s21_s8, 2048, %s23_s12, [#allocation3], %s289_s9, %s289_s9, %s290_s10  }
   0x8   :  { %s52_s16 = sshll.u32 %s292_s3, 4  ;;  %s53_s16 = int_to_ptr.vmem [resolvable:$true] %s52_s16 }
   0x9   :  { %58 = dma.hbm_to_vmem [thread:$0]  %s51_s15, 2048, %s53_s16, [#allocation5], %s289_s9, %s289_s9, %s290_s10  }
   0xa   :  { %284 = dma.done.wait [#allocation3], 2048  }
   0xb   :  { %285 = vsyncadd [#allocation3], 4294965248 }
   0xc   :  { %286 = dma.done.wait [#allocation5], 4096  }
   0xd   :  { %287 = vsyncadd [#allocation5], 4294963200  ;;  %v89_v0 = vld [vmem:[#allocation2 + $0x78] sm:$0xff]  ;;  %v88_v1 = vld [vmem:[#allocation2 + $0x70] sm:$0xff] }
   0xe   :  { %94 = vmatpush.msra.mxu0 %v89_v0  ;;  %v87_v2 = vld [vmem:[#allocation2 + $0x68] sm:$0xff]  ;;  %v86_v3 = vld [vmem:[#allocation2 + $0x60] sm:$0xff]  ;;  %v130_v4 = vld [vmem:[#allocation4 + $0x78] sm:$0xff] }
   0xf   :  { %v85_v5 = vld [vmem:[#allocation2 + $0x58] sm:$0xff]  ;;  %135 = vmatpush.msra.mxu1 %v130_v4  ;;  %v129_v6 = vld [vmem:[#allocation4 + $0x70] sm:$0xff]  ;;  %v128_v7 = vld [vmem:[#allocation4 + $0x68] sm:$0xff] }
  0x10   :  { %95 = vmatpush.msra.mxu0 %v88_v1  ;;  %v84_v8 = vld [vmem:[#allocation2 + $0x50] sm:$0xff]  ;;  %v127_v9 = vld [vmem:[#allocation4 + $0x60] sm:$0xff]  ;;  %v83_v10 = vld [vmem:[#allocation2 + $0x48] sm:$0xff] }
  0x11   :  { %136 = vmatpush.msra.mxu1 %v129_v6  ;;  %v126_v11 = vld [vmem:[#allocation4 + $0x58] sm:$0xff]  ;;  %v82_v12 = vld [vmem:[#allocation2 + $0x40] sm:$0xff]  ;;  %v125_v13 = vld [vmem:[#allocation4 + $0x50] sm:$0xff] }
  0x12   :  { %96 = vmatpush.msra.mxu0 %v87_v2  ;;  %v81_v14 = vld [vmem:[#allocation2 + $0x38] sm:$0xff]  ;;  %v124_v15 = vld [vmem:[#allocation4 + $0x48] sm:$0xff]  ;;  %v80_v16 = vld [vmem:[#allocation2 + $0x30] sm:$0xff] }
  0x13   :  { %137 = vmatpush.msra.mxu1 %v128_v7  ;;  %v123_v17 = vld [vmem:[#allocation4 + $0x40] sm:$0xff]  ;;  %v79_v18 = vld [vmem:[#allocation2 + $0x28] sm:$0xff]  ;;  %v122_v19 = vld [vmem:[#allocation4 + $0x38] sm:$0xff] }
  0x14   :  { %97 = vmatpush.msra.mxu0 %v86_v3  ;;  %v78_v20 = vld [vmem:[#allocation2 + $0x20] sm:$0xff]  ;;  %v121_v21 = vld [vmem:[#allocation4 + $0x30] sm:$0xff]  ;;  %v77_v22 = vld [vmem:[#allocation2 + $0x18] sm:$0xff] }
  0x15   :  { %138 = vmatpush.msra.mxu1 %v127_v9  ;;  %v120_v23 = vld [vmem:[#allocation4 + $0x28] sm:$0xff]  ;;  %v76_v24 = vld [vmem:[#allocation2 + $0x10] sm:$0xff]  ;;  %v119_v25 = vld [vmem:[#allocation4 + $0x20] sm:$0xff] }
  0x16   :  { %98 = vmatpush.msra.mxu0 %v85_v5  ;;  %v75_v26 = vld [vmem:[#allocation2 + $0x8] sm:$0xff]  ;;  %v118_v27 = vld [vmem:[#allocation4 + $0x18] sm:$0xff]  ;;  %v74_v28 = vld [vmem:[#allocation2] sm:$0xff] }
  0x17   :  { %139 = vmatpush.msra.mxu1 %v126_v11  ;;  %v73_v29 = vld [vmem:[%s357_s0] sm:$0xff]  ;;  %v117_v30 = vld [vmem:[#allocation4 + $0x10] sm:$0xff]  ;;  %v116_v31 = vld [vmem:[#allocation4 + $0x8] sm:$0xff] }
  0x18   :  { %99 = vmatpush.msra.mxu0 %v84_v8  ;;  %v115_v32 = vld [vmem:[#allocation4] sm:$0xff]  ;;  %v171_v33 = vld [vmem:[#allocation6 + $0x78] sm:$0xff]  ;;  %v170_v34 = vld [vmem:[#allocation6 + $0x70] sm:$0xff] }
  0x19   :  { %140 = vmatpush.msra.mxu1 %v125_v13  ;;  %176 = vmatpush.msra.mxu2 %v171_v33  ;;  %v169_v35 = vld [vmem:[#allocation6 + $0x68] sm:$0xff]  ;;  %v168_v36 = vld [vmem:[#allocation6 + $0x60] sm:$0xff]  ;;  %v167_v37 = vld [vmem:[#allocation6 + $0x58] sm:$0xff] }
  0x1a   :  { %100 = vmatpush.msra.mxu0 %v83_v10  ;;  %v166_v38 = vld [vmem:[#allocation6 + $0x50] sm:$0xff]  ;;  %v165_v39 = vld [vmem:[#allocation6 + $0x48] sm:$0xff]  ;;  %v164_v40 = vld [vmem:[#allocation6 + $0x40] sm:$0xff] }
  0x1b   :  { %141 = vmatpush.msra.mxu1 %v124_v15  ;;  %177 = vmatpush.msra.mxu2 %v170_v34  ;;  %v163_v41 = vld [vmem:[#allocation6 + $0x38] sm:$0xff]  ;;  %v162_v42 = vld [vmem:[#allocation6 + $0x30] sm:$0xff]  ;;  %v161_v43 = vld [vmem:[#allocation6 + $0x28] sm:$0xff] }
  0x1c   :  { %101 = vmatpush.msra.mxu0 %v82_v12  ;;  %v160_v44 = vld [vmem:[#allocation6 + $0x20] sm:$0xff]  ;;  %v159_v45 = vld [vmem:[#allocation6 + $0x18] sm:$0xff]  ;;  %v158_v50 = vld [vmem:[#allocation6 + $0x10] sm:$0xff] }
  0x1d   :  { %142 = vmatpush.msra.mxu1 %v123_v17  ;;  %178 = vmatpush.msra.mxu2 %v169_v35  ;;  %v209_v46 = vld [vmem:[%s359_s2] ss:$0 sm:$0xff]  ;;  %v157_v51 = vld [vmem:[#allocation6 + $0x8] sm:$0xff] }
  0x1e   :  { %102 = vmatpush.msra.mxu0 %v81_v14  ;;  %v156_v52 = vld [vmem:[#allocation6] sm:$0xff] }
  0x1f   :  { %143 = vmatpush.msra.mxu1 %v122_v19  ;;  %179 = vmatpush.msra.mxu2 %v168_v36  ;;  %v210_v53 = vld [vmem:[%s361_s4] ss:$0 sm:$0xff] }
  0x20   :  { %103 = vmatpush.msra.mxu0 %v80_v16  ;;  %v211_v57 = vld [vmem:[%s363_s6] ss:$0 sm:$0xff] }
  0x21   :  { %144 = vmatpush.msra.mxu1 %v121_v21  ;;  %180 = vmatpush.msra.mxu2 %v167_v37 }
  0x22   :  { %104 = vmatpush.msra.mxu0 %v79_v18 }
  0x23   :  { %145 = vmatpush.msra.mxu1 %v120_v23  ;;  %181 = vmatpush.msra.mxu2 %v166_v38 }
  0x24   :  { %105 = vmatpush.msra.mxu0 %v78_v20 }
  0x25   :  { %146 = vmatpush.msra.mxu1 %v119_v25  ;;  %182 = vmatpush.msra.mxu2 %v165_v39 }
  0x26   :  { %106 = vmatpush.msra.mxu0 %v77_v22 }
  0x27   :  { %147 = vmatpush.msra.mxu1 %v118_v27  ;;  %183 = vmatpush.msra.mxu2 %v164_v40 }
  0x28   :  { %107 = vmatpush.msra.mxu0 %v76_v24 }
  0x29   :  { %148 = vmatpush.msra.mxu1 %v117_v30  ;;  %184 = vmatpush.msra.mxu2 %v163_v41 }
  0x2a   :  { %108 = vmatpush.msra.mxu0 %v75_v26 }
  0x2b   :  { %149 = vmatpush.msra.mxu1 %v116_v31  ;;  %185 = vmatpush.msra.mxu2 %v162_v42 }
  0x2c   :  { %109 = vmatpush.msra.mxu0 %v74_v28 }
  0x2d   :  { %110 = vmatmul.f32.vlgmr.msra.gmra.mxu0 %v73_v29  ;;  %150 = vmatpush.msra.mxu1 %v115_v32 }
  0x2e   :  { %186 = vmatpush.msra.mxu2 %v161_v43 }
  0x30   :  { %187 = vmatpush.msra.mxu2 %v160_v44 }
  0x32   :  { %188 = vmatpush.msra.mxu2 %v159_v45 }
  0x34   :  { %189 = vmatpush.msra.mxu2 %v158_v50 }
  0x36   :  { %190 = vmatpush.msra.mxu2 %v157_v51 }
  0x38   :  { %191 = vmatpush.msra.mxu2 %v156_v52 }
  0xaa   :  { %v111_v47 = vpop.f32.mrf.mxu0 }
  0xab   :  { %v112_v48 = vadd.f32 %v209_v46, %v111_v47 }
  0xad   :  { %v114_v49 = vmax.f32 %v112_v48, 0.0 }
  0xaf   :  { %151 = vmatmul.f32.vlgmr.msra.gmra.mxu1 %v114_v49 }
 0x12c   :  { %v152_v54 = vpop.f32.mrf.mxu1 }
 0x12d   :  { %v153_v55 = vadd.f32 %v210_v53, %v152_v54 }
 0x12f   :  { %v155_v56 = vmax.f32 %v153_v55, 0.0 }
 0x131   :  { %192 = vmatmul.f32.vlgmr.msra.gmra.mxu2 %v155_v56 }
 0x1b4   :  { %v193_v58 = vpop.f32.mrf.mxu2 }
 0x1b5   :  { %v194_v59 = vadd.f32 %v211_v57, %v193_v58 }
 0x1b7   :  { %v196_v60 = vmax.f32 %v194_v59, 0.0 }
 0x1b9   :  { %197 = vst [vmem:[%s364_s7] sm:$0xff] %v196_v60 }
 0x1ba   :  { %202 = vsyncpa [#allocation3], 1 }
 0x1bb   :  { %203 = vsyncpa [#allocation5], 1 }

// kernel: _mlp_forward.1
= control target key start
LH: loop header
LB: loop body
LE: loop exit
PB: predicated region body
PF: predicated region fallthrough
CT: control target
= control target key end

     0   :  { %12 = vsyncpa [#allocation3], 0  ;;  %s357_s0 = inlined_call_operand.vmem [shape: f32[8,128], index: 0, kind: input, shape index: {}]   ;;  %s358_s1 = inlined_call_operand.hbm [shape: f32[1,128,128], index: 1, kind: input, shape index: {}]   ;;  %s359_s2 = inlined_call_operand.vmem [shape: f32[1,1,128], index: 2, kind: input, shape index: {}]   ;;  %s360_s3 = inlined_call_operand.hbm [shape: f32[1,1,128,128], index: 3, kind: input, shape index: {}]   ;;  %s361_s4 = inlined_call_operand.vmem [shape: f32[1,1,1,128], index: 4, kind: input, shape index: {}]   ;;  %s362_s5 = inlined_call_operand.hbm [shape: f32[128,128], index: 5, kind: input, shape index: {}]   ;;  %s363_s6 = inlined_call_operand.vmem [shape: f32[1,128], index: 6, kind: input, shape index: {}]   ;;  %s364_s7 = inlined_call_operand.vmem [shape: f32[8,128], index: 7, kind: output, shape index: {}]  }
   0x1   :  { %13 = vsyncpa [#allocation5], 0  ;;  %s35_s26 = sshll.u32 %s360_s3, 4  ;;  %s288_s27 = smov [#allocation4]   ;;  %s36_s26 = int_to_ptr.hbm [resolvable:$true] %s35_s26 }
   0x2   :  { %s37_s28 = sshll.u32 %s288_s27, 4  ;;  %s20_s8 = sshll.u32 %s358_s1, 4  ;;  %s38_s28 = int_to_ptr.vmem [resolvable:$true] %s37_s28  ;;  %s21_s8 = int_to_ptr.hbm [resolvable:$true] %s20_s8 }
   0x3   :  { %s289_s9 = smov 128   ;;  %s290_s10 = smov 8  }
   0x4   :  { %43 = dma.hbm_to_vmem [thread:$0]  %s36_s26, 2048, %s38_s28, [#allocation5], %s289_s9, %s289_s9, %s290_s10  }
   0x5   :  { %s291_s11 = smov [#allocation2]   ;;  %s50_s15 = sshll.u32 %s362_s5, 4  ;;  %s51_s15 = int_to_ptr.hbm [resolvable:$true] %s50_s15 }
   0x6   :  { %s22_s12 = sshll.u32 %s291_s11, 4  ;;  %s292_s3 = smov [#allocation6]   ;;  %s23_s12 = int_to_ptr.vmem [resolvable:$true] %s22_s12 }
   0x7   :  { %28 = dma.hbm_to_vmem [thread:$0]  %s21_s8, 2048, %s23_s12, [#allocation3], %s289_s9, %s289_s9, %s290_s10  }
   0x8   :  { %s52_s16 = sshll.u32 %s292_s3, 4  ;;  %s53_s16 = int_to_ptr.vmem [resolvable:$true] %s52_s16 }
   0x9   :  { %58 = dma.hbm_to_vmem [thread:$0]  %s51_s15, 2048, %s53_s16, [#allocation5], %s289_s9, %s289_s9, %s290_s10  }
   0xa   :  { %284 = dma.done.wait [#allocation3], 2048  }
   0xb   :  { %285 = vsyncadd [#allocation3], 4294965248 }
   0xc   :  { %286 = dma.done.wait [#allocation5], 4096  }
   0xd   :  { %287 = vsyncadd [#allocation5], 4294963200  ;;  %v89_v0 = vld [vmem:[#allocation2 + $0x78] sm:$0xff]  ;;  %v88_v1 = vld [vmem:[#allocation2 + $0x70] sm:$0xff] }
   0xe   :  { %94 = vmatpush.msra.mxu0 %v89_v0  ;;  %v87_v2 = vld [vmem:[#allocation2 + $0x68] sm:$0xff]  ;;  %v86_v3 = vld [vmem:[#allocation2 + $0x60] sm:$0xff]  ;;  %v130_v4 = vld [vmem:[#allocation4 + $0x78] sm:$0xff] }
   0xf   :  { %v85_v5 = vld [vmem:[#allocation2 + $0x58] sm:$0xff]  ;;  %135 = vmatpush.msra.mxu1 %v130_v4  ;;  %v129_v6 = vld [vmem:[#allocation4 + $0x70] sm:$0xff]  ;;  %v128_v7 = vld [vmem:[#allocation4 + $0x68] sm:$0xff] }
  0x10   :  { %95 = vmatpush.msra.mxu0 %v88_v1  ;;  %v84_v8 = vld [vmem:[#allocation2 + $0x50] sm:$0xff]  ;;  %v127_v9 = vld [vmem:[#allocation4 + $0x60] sm:$0xff]  ;;  %v83_v10 = vld [vmem:[#allocation2 + $0x48] sm:$0xff] }
  0x11   :  { %136 = vmatpush.msra.mxu1 %v129_v6  ;;  %v126_v11 = vld [vmem:[#allocation4 + $0x58] sm:$0xff]  ;;  %v82_v12 = vld [vmem:[#allocation2 + $0x40] sm:$0xff]  ;;  %v125_v13 = vld [vmem:[#allocation4 + $0x50] sm:$0xff] }
  0x12   :  { %96 = vmatpush.msra.mxu0 %v87_v2  ;;  %v81_v14 = vld [vmem:[#allocation2 + $0x38] sm:$0xff]  ;;  %v124_v15 = vld [vmem:[#allocation4 + $0x48] sm:$0xff]  ;;  %v80_v16 = vld [vmem:[#allocation2 + $0x30] sm:$0xff] }
  0x13   :  { %137 = vmatpush.msra.mxu1 %v128_v7  ;;  %v123_v17 = vld [vmem:[#allocation4 + $0x40] sm:$0xff]  ;;  %v79_v18 = vld [vmem:[#allocation2 + $0x28] sm:$0xff]  ;;  %v122_v19 = vld [vmem:[#allocation4 + $0x38] sm:$0xff] }
  0x14   :  { %97 = vmatpush.msra.mxu0 %v86_v3  ;;  %v78_v20 = vld [vmem:[#allocation2 + $0x20] sm:$0xff]  ;;  %v121_v21 = vld [vmem:[#allocation4 + $0x30] sm:$0xff]  ;;  %v77_v22 = vld [vmem:[#allocation2 + $0x18] sm:$0xff] }
  0x15   :  { %138 = vmatpush.msra.mxu1 %v127_v9  ;;  %v120_v23 = vld [vmem:[#allocation4 + $0x28] sm:$0xff]  ;;  %v76_v24 = vld [vmem:[#allocation2 + $0x10] sm:$0xff]  ;;  %v119_v25 = vld [vmem:[#allocation4 + $0x20] sm:$0xff] }
  0x16   :  { %98 = vmatpush.msra.mxu0 %v85_v5  ;;  %v75_v26 = vld [vmem:[#allocation2 + $0x8] sm:$0xff]  ;;  %v118_v27 = vld [vmem:[#allocation4 + $0x18] sm:$0xff]  ;;  %v74_v28 = vld [vmem:[#allocation2] sm:$0xff] }
  0x17   :  { %139 = vmatpush.msra.mxu1 %v126_v11  ;;  %v73_v29 = vld [vmem:[%s357_s0] sm:$0xff]  ;;  %v117_v30 = vld [vmem:[#allocation4 + $0x10] sm:$0xff]  ;;  %v116_v31 = vld [vmem:[#allocation4 + $0x8] sm:$0xff] }
  0x18   :  { %99 = vmatpush.msra.mxu0 %v84_v8  ;;  %v115_v32 = vld [vmem:[#allocation4] sm:$0xff]  ;;  %v171_v33 = vld [vmem:[#allocation6 + $0x78] sm:$0xff]  ;;  %v170_v34 = vld [vmem:[#allocation6 + $0x70] sm:$0xff] }
  0x19   :  { %140 = vmatpush.msra.mxu1 %v125_v13  ;;  %176 = vmatpush.msra.mxu2 %v171_v33  ;;  %v169_v35 = vld [vmem:[#allocation6 + $0x68] sm:$0xff]  ;;  %v168_v36 = vld [vmem:[#allocation6 + $0x60] sm:$0xff]  ;;  %v167_v37 = vld [vmem:[#allocation6 + $0x58] sm:$0xff] }
  0x1a   :  { %100 = vmatpush.msra.mxu0 %v83_v10  ;;  %v166_v38 = vld [vmem:[#allocation6 + $0x50] sm:$0xff]  ;;  %v165_v39 = vld [vmem:[#allocation6 + $0x48] sm:$0xff]  ;;  %v164_v40 = vld [vmem:[#allocation6 + $0x40] sm:$0xff] }
  0x1b   :  { %141 = vmatpush.msra.mxu1 %v124_v15  ;;  %177 = vmatpush.msra.mxu2 %v170_v34  ;;  %v163_v41 = vld [vmem:[#allocation6 + $0x38] sm:$0xff]  ;;  %v162_v42 = vld [vmem:[#allocation6 + $0x30] sm:$0xff]  ;;  %v161_v43 = vld [vmem:[#allocation6 + $0x28] sm:$0xff] }
  0x1c   :  { %101 = vmatpush.msra.mxu0 %v82_v12  ;;  %v160_v44 = vld [vmem:[#allocation6 + $0x20] sm:$0xff]  ;;  %v159_v45 = vld [vmem:[#allocation6 + $0x18] sm:$0xff]  ;;  %v158_v50 = vld [vmem:[#allocation6 + $0x10] sm:$0xff] }
  0x1d   :  { %142 = vmatpush.msra.mxu1 %v123_v17  ;;  %178 = vmatpush.msra.mxu2 %v169_v35  ;;  %v209_v46 = vld [vmem:[%s359_s2] ss:$0 sm:$0xff]  ;;  %v157_v51 = vld [vmem:[#allocation6 + $0x8] sm:$0xff] }
  0x1e   :  { %102 = vmatpush.msra.mxu0 %v81_v14  ;;  %v156_v52 = vld [vmem:[#allocation6] sm:$0xff] }
  0x1f   :  { %143 = vmatpush.msra.mxu1 %v122_v19  ;;  %179 = vmatpush.msra.mxu2 %v168_v36  ;;  %v210_v53 = vld [vmem:[%s361_s4] ss:$0 sm:$0xff] }
  0x20   :  { %103 = vmatpush.msra.mxu0 %v80_v16  ;;  %v211_v57 = vld [vmem:[%s363_s6] ss:$0 sm:$0xff] }
  0x21   :  { %144 = vmatpush.msra.mxu1 %v121_v21  ;;  %180 = vmatpush.msra.mxu2 %v167_v37 }
  0x22   :  { %104 = vmatpush.msra.mxu0 %v79_v18 }
  0x23   :  { %145 = vmatpush.msra.mxu1 %v120_v23  ;;  %181 = vmatpush.msra.mxu2 %v166_v38 }
  0x24   :  { %105 = vmatpush.msra.mxu0 %v78_v20 }
  0x25   :  { %146 = vmatpush.msra.mxu1 %v119_v25  ;;  %182 = vmatpush.msra.mxu2 %v165_v39 }
  0x26   :  { %106 = vmatpush.msra.mxu0 %v77_v22 }
  0x27   :  { %147 = vmatpush.msra.mxu1 %v118_v27  ;;  %183 = vmatpush.msra.mxu2 %v164_v40 }
  0x28   :  { %107 = vmatpush.msra.mxu0 %v76_v24 }
  0x29   :  { %148 = vmatpush.msra.mxu1 %v117_v30  ;;  %184 = vmatpush.msra.mxu2 %v163_v41 }
  0x2a   :  { %108 = vmatpush.msra.mxu0 %v75_v26 }
  0x2b   :  { %149 = vmatpush.msra.mxu1 %v116_v31  ;;  %185 = vmatpush.msra.mxu2 %v162_v42 }
  0x2c   :  { %109 = vmatpush.msra.mxu0 %v74_v28 }
  0x2d   :  { %110 = vmatmul.f32.vlgmr.msra.gmra.mxu0 %v73_v29  ;;  %150 = vmatpush.msra.mxu1 %v115_v32 }
  0x2e   :  { %186 = vmatpush.msra.mxu2 %v161_v43 }
  0x30   :  { %187 = vmatpush.msra.mxu2 %v160_v44 }
  0x32   :  { %188 = vmatpush.msra.mxu2 %v159_v45 }
  0x34   :  { %189 = vmatpush.msra.mxu2 %v158_v50 }
  0x36   :  { %190 = vmatpush.msra.mxu2 %v157_v51 }
  0x38   :  { %191 = vmatpush.msra.mxu2 %v156_v52 }
  0xaa   :  { %v111_v47 = vpop.f32.mrf.mxu0 }
  0xab   :  { %v112_v48 = vadd.f32 %v209_v46, %v111_v47 }
  0xad   :  { %v114_v49 = vmax.f32 %v112_v48, 0.0 }
  0xaf   :  { %151 = vmatmul.f32.vlgmr.msra.gmra.mxu1 %v114_v49 }
 0x12c   :  { %v152_v54 = vpop.f32.mrf.mxu1 }
 0x12d   :  { %v153_v55 = vadd.f32 %v210_v53, %v152_v54 }
 0x12f   :  { %v155_v56 = vmax.f32 %v153_v55, 0.0 }
 0x131   :  { %192 = vmatmul.f32.vlgmr.msra.gmra.mxu2 %v155_v56 }
 0x1b4   :  { %v193_v58 = vpop.f32.mrf.mxu2 }
 0x1b5   :  { %v194_v59 = vadd.f32 %v211_v57, %v193_v58 }
 0x1b7   :  { %v196_v60 = vmax.f32 %v194_v59, 0.0 }
 0x1b9   :  { %197 = vst [vmem:[%s364_s7] sm:$0xff] %v196_v60 }
 0x1ba   :  { %202 = vsyncpa [#allocation3], 1 }
 0x1bb   :  { %203 = vsyncpa [#allocation5], 1 }

</bundles_post_ra>
